<compile_context>
chip_gen: v6e
topology: v6e:2x2x1
jax: 0.10.0
libtpu: 0.0.40
codegen_flags: <defaults>
</compile_context>

<pallas_src>
import jax
import jax.numpy as jnp
from jax.experimental import pallas as pl
from jax.experimental.pallas import tpu as pltpu


def mlp_kernel(x_ref, w1_ref, b1_ref, w2_ref, b2_ref, out1_ref, out2_ref):
    # fc1 on the MXU: (TB, in) @ (in, hid) -> (TB, hid); bias + ReLU on the VPU.
    x = x_ref[...]                                        # (TB, in)
    h = jnp.dot(x, w1_ref[...],
                preferred_element_type=jnp.float32)       # (TB, hid)
    h = jnp.maximum(h + b1_ref[...], 0.0)                 # broadcast (1, hid)
    out1_ref[...] = h.astype(out1_ref.dtype)

    # fc2 has output_dim == 1: a full MXU pass producing one output lane is
    # <1% utilized, so compute it as a VPU multiply + lane (XLU) reduction.
    w2_row = w2_ref[...]                                  # (1, hid)
    y = jnp.sum(h * w2_row, axis=-1, keepdims=True)       # (TB, 1)
    y = y + b2_ref[0, 0]                                  # scalar bias from SMEM
    # NOTE: out2's lane width of 1 forces masked partial stores; negligible
    # here since out1 dominates write traffic.
    out2_ref[...] = y.astype(out2_ref.dtype)


def net_forward(x, w1_t, b1, w2, b2, *, block_b=512):
    """Forward pass of Net.

    x    : (B, input_dim) f32
    w1_t : (input_dim, hidden_dim)   -- fc1 weight, pre-transposed for x @ W
    b1   : (hidden_dim,)
    w2   : (output_dim, hidden_dim)  -- fc2 weight in PyTorch layout (output_dim == 1)
    b2   : (output_dim,)
    Returns (out1 (B, hidden_dim), out2 (B, output_dim)).
    """
    B, input_dim = x.shape
    hidden_dim = w1_t.shape[1]
    output_dim = w2.shape[0]
    assert output_dim == 1, "Net's fc2 has output_dim == 1"

    # Batch tile: big enough to amortize per-step overhead, rounded to the
    # 8-sublane granularity, capped at the (padded) batch.
    tb = max(8, min(block_b, B))
    tb = ((tb + 7) // 8) * 8
    b_pad = pl.cdiv(B, tb) * tb
    if b_pad != B:
        x = jnp.pad(x, ((0, b_pad - B), (0, 0)))

    b1_row = b1.reshape(1, hidden_dim).astype(jnp.float32)
    b2_smem = b2.reshape(1, 1).astype(jnp.float32)

    grid = (b_pad // tb,)

    flops = 2 * b_pad * (input_dim * hidden_dim + hidden_dim * output_dim)
    bytes_accessed = 4 * (
        b_pad * (input_dim + hidden_dim + output_dim)
        + input_dim * hidden_dim + hidden_dim
        + hidden_dim * output_dim + output_dim
    )

    out1, out2 = pl.pallas_call(
        mlp_kernel,
        out_shape=(
            jax.ShapeDtypeStruct((b_pad, hidden_dim), jnp.float32),
            jax.ShapeDtypeStruct((b_pad, output_dim), jnp.float32),
        ),
        grid=grid,
        in_specs=[
            pl.BlockSpec((tb, input_dim), lambda i: (i, 0)),           # x tile (pipelined)
            pl.BlockSpec((input_dim, hidden_dim), lambda i: (0, 0)),   # w1: VMEM-resident
            pl.BlockSpec((1, hidden_dim), lambda i: (0, 0)),           # b1: VMEM-resident
            pl.BlockSpec((output_dim, hidden_dim), lambda i: (0, 0)),  # w2 row: VMEM-resident
            pl.BlockSpec(memory_space=pltpu.MemorySpace.SMEM),         # b2: scalar in SMEM
        ],
        out_specs=(
            pl.BlockSpec((tb, hidden_dim), lambda i: (i, 0)),
            pl.BlockSpec((tb, output_dim), lambda i: (i, 0)),
        ),
        compiler_params=pltpu.CompilerParams(
            dimension_semantics=("parallel",),
        ),
        cost_estimate=pl.CostEstimate(
            flops=flops, transcendentals=0, bytes_accessed=bytes_accessed),
    )(x, w1_t, b1_row, w2, b2_smem)

    if b_pad != B:
        out1 = out1[:B]
        out2 = out2[:B]
    return out1, out2


def init_linear_params(key, fan_in, fan_out, *, transpose_weight):
    # Deterministic init matching nn.Linear's default U(-1/sqrt(fan_in), 1/sqrt(fan_in)).
    kw, kb = jax.random.split(key)
    bound = 1.0 / (fan_in ** 0.5)
    if transpose_weight:
        # store as (fan_in, fan_out) for the kernel's x @ W layout
        w = jax.random.uniform(kw, (fan_in, fan_out), jnp.float32, -bound, bound)
    else:
        # PyTorch layout (fan_out, fan_in) -- used as a row for the VPU reduction
        w = jax.random.uniform(kw, (fan_out, fan_in), jnp.float32, -bound, bound)
    b = jax.random.uniform(kb, (fan_out,), jnp.float32, -bound, bound)
    return w, b


if __name__ == "__main__":
    # wine_train.csv has 11 feature columns + 1 target => input_dim = 11
    input_dim = 11
    hidden_dim = 11
    output_dim = 1
    batch = 1024          # two 512-row batch tiles -> exercises grid + pipelining

    key = jax.random.PRNGKey(0)
    kx, k1, k2 = jax.random.split(key, 3)

    x = jax.random.normal(kx, (batch, input_dim), jnp.float32)
    w1_t, b1 = init_linear_params(k1, input_dim, hidden_dim, transpose_weight=True)
    w2, b2 = init_linear_params(k2, hidden_dim, output_dim, transpose_weight=False)

    out1, out2 = net_forward(x, w1_t, b1, w2, b2)
    jax.block_until_ready((out1, out2))

    # Pure-JAX reference check of the forward semantics.
    ref1 = jnp.maximum(x @ w1_t + b1, 0.0)
    ref2 = ref1 @ w2.T + b2
    assert out1.shape == (batch, hidden_dim) and out2.shape == (batch, output_dim)
    assert jnp.allclose(out1, ref1, atol=1e-5), "out1 mismatch"
    assert jnp.allclose(out2, ref2, atol=1e-4), "out2 mismatch"

    print("KERNEL_OK")
</pallas_src>

<mosaic_0001>
module attributes {stable_mosaic.version = 11 : i64} {
  func.func @mlp_kernel(%arg0: i32, %arg1: memref<512x11xf32, #tpu.memory_space<vmem>>, %arg2: memref<11x11xf32, #tpu.memory_space<vmem>>, %arg3: memref<1x11xf32, #tpu.memory_space<vmem>>, %arg4: memref<1x11xf32, #tpu.memory_space<vmem>>, %arg5: memref<1x1xf32, #tpu.memory_space<smem>>, %arg6: memref<512x11xf32, #tpu.memory_space<vmem>>, %arg7: memref<512x1xf32, #tpu.memory_space<vmem>>) attributes {dimension_semantics = [#tpu.dimension_semantics<parallel>], iteration_bounds = array<i64: 2>, scalar_prefetch = 0 : i64, scratch_operands = 0 : i64, tpu.core_type = #tpu.core_type<tc>, window_params = [{transform_indices = @transform_0, window_bounds = array<i64: 512, 11>}, {pipeline_mode = #tpu.pipeline_mode<synchronous>, transform_indices = @transform_1, window_bounds = array<i64: 11, 11>}, {pipeline_mode = #tpu.pipeline_mode<synchronous>, transform_indices = @transform_2, window_bounds = array<i64: 1, 11>}, {pipeline_mode = #tpu.pipeline_mode<synchronous>, transform_indices = @transform_3, window_bounds = array<i64: 1, 11>}, {transform_indices = @transform_4, window_bounds = array<i64: 1, 1>}, {transform_indices = @transform_5, window_bounds = array<i64: 512, 11>}, {transform_indices = @transform_6, window_bounds = array<i64: 512, 1>}]} {
    %c0 = arith.constant 0 : index
    %c0_0 = arith.constant 0 : index
    %0 = vector.load %arg1[%c0, %c0_0] : memref<512x11xf32, #tpu.memory_space<vmem>>, vector<512x11xf32>
    %c0_1 = arith.constant 0 : index
    %c0_2 = arith.constant 0 : index
    %1 = vector.load %arg2[%c0_1, %c0_2] : memref<11x11xf32, #tpu.memory_space<vmem>>, vector<11x11xf32>
    %cst = arith.constant dense<0.000000e+00> : vector<512x11xf32>
    %2 = tpu.matmul %0, %1, %cst {dimension_numbers = #tpu.dot_dimension_numbers<[1], [0], [0], [1], [0, 0, 1, 1], [], []>} : vector<512x11xf32>, vector<11x11xf32>, vector<512x11xf32> -> vector<512x11xf32>
    %c0_3 = arith.constant 0 : index
    %c0_4 = arith.constant 0 : index
    %3 = vector.load %arg3[%c0_3, %c0_4] : memref<1x11xf32, #tpu.memory_space<vmem>>, vector<1x11xf32>
    %4 = vector.broadcast %3 : vector<1x11xf32> to vector<512x11xf32>
    %5 = arith.addf %2, %4 : vector<512x11xf32>
    %cst_5 = arith.constant 0.000000e+00 : f32
    %6 = vector.broadcast %cst_5 : f32 to vector<512x11xf32>
    %7 = arith.maximumf %5, %6 : vector<512x11xf32>
    %c0_6 = arith.constant 0 : index
    %c0_7 = arith.constant 0 : index
    %8 = vector.load %arg6[%c0_6, %c0_7] : memref<512x11xf32, #tpu.memory_space<vmem>>, vector<512x11xf32>
    tpu.vector_store %arg6[%c0_6, %c0_7], %7 {strides = array<i32>} : memref<512x11xf32, #tpu.memory_space<vmem>>, vector<512x11xf32>,
    %c0_8 = arith.constant 0 : index
    %c0_9 = arith.constant 0 : index
    %9 = vector.load %arg4[%c0_8, %c0_9] : memref<1x11xf32, #tpu.memory_space<vmem>>, vector<1x11xf32>
    %10 = vector.broadcast %9 : vector<1x11xf32> to vector<512x11xf32>
    %11 = arith.mulf %7, %10 : vector<512x11xf32>
    %cst_10 = arith.constant dense<0.000000e+00> : vector<512xf32>
    %12 = vector.multi_reduction <add>, %11, %cst_10 [1] : vector<512x11xf32> to vector<512xf32>
    %13 = vector.shape_cast %12 : vector<512xf32> to vector<512x1xf32>
    %c0_11 = arith.constant 0 : index
    %c0_12 = arith.constant 0 : index
    %14 = memref.load %arg5[%c0_11, %c0_12] : memref<1x1xf32, #tpu.memory_space<smem>>
    %15 = vector.broadcast %14 : f32 to vector<512x1xf32>
    %16 = arith.addf %13, %15 : vector<512x1xf32>
    %c0_13 = arith.constant 0 : index
    %c0_14 = arith.constant 0 : index
    %17 = vector.load %arg7[%c0_13, %c0_14] : memref<512x1xf32, #tpu.memory_space<vmem>>, vector<512x1xf32>
    tpu.vector_store %arg7[%c0_13, %c0_14], %16 {strides = array<i32>} : memref<512x1xf32, #tpu.memory_space<vmem>>, vector<512x1xf32>,
    return
  }
  func.func @transform_0(%arg0: i32) -> (i32, i32) {
    %c0_i32 = arith.constant 0 : i32
    %c0_i32_0 = arith.constant 0 : i32
    return %arg0, %c0_i32 : i32, i32
  }
  func.func @transform_1(%arg0: i32) -> (i32, i32) {
    %c0_i32 = arith.constant 0 : i32
    %c0_i32_0 = arith.constant 0 : i32
    %c0_i32_1 = arith.constant 0 : i32
    return %c0_i32, %c0_i32_0 : i32, i32
  }
  func.func @transform_2(%arg0: i32) -> (i32, i32) {
    %c0_i32 = arith.constant 0 : i32
    %c0_i32_0 = arith.constant 0 : i32
    %c0_i32_1 = arith.constant 0 : i32
    return %c0_i32, %c0_i32_0 : i32, i32
  }
  func.func @transform_3(%arg0: i32) -> (i32, i32) {
    %c0_i32 = arith.constant 0 : i32
    %c0_i32_0 = arith.constant 0 : i32
    %c0_i32_1 = arith.constant 0 : i32
    return %c0_i32, %c0_i32_0 : i32, i32
  }
  func.func @transform_4(%arg0: i32) -> (i32, i32) {
    %c0_i32 = arith.constant 0 : i32
    %c0_i32_0 = arith.constant 0 : i32
    %c0_i32_1 = arith.constant 0 : i32
    return %c0_i32, %c0_i32_0 : i32, i32
  }
  func.func @transform_5(%arg0: i32) -> (i32, i32) {
    %c0_i32 = arith.constant 0 : i32
    %c0_i32_0 = arith.constant 0 : i32
    return %arg0, %c0_i32 : i32, i32
  }
  func.func @transform_6(%arg0: i32) -> (i32, i32) {
    %c0_i32 = arith.constant 0 : i32
    %c0_i32_0 = arith.constant 0 : i32
    return %arg0, %c0_i32 : i32, i32
  }
}

</mosaic_0001>

<bundles_post_ra>
// kernel: tpu_custom_call.1
= control target key start
LH: loop header
LB: loop body
LE: loop exit
PB: predicated region body
PF: predicated region fallthrough
CT: control target
= control target key end

     0   :  { %s1841_s23 = smov 0   ;;  %s2892_s0 = inlined_call_operand.vmem [shape: f32[1024,11], index: 0, kind: input, shape index: {}]   ;;  %s2893_s1 = inlined_call_operand.vmem [shape: f32[11,11], index: 1, kind: input, shape index: {}]   ;;  %s2894_s2 = inlined_call_operand.vmem [shape: f32[1,11], index: 2, kind: input, shape index: {}]   ;;  %s2895_s3 = inlined_call_operand.vmem [shape: f32[1,11], index: 3, kind: input, shape index: {}]   ;;  %s2896_s4 = inlined_call_operand.<no memory space> [shape: f32[1,1], index: 4, kind: input, shape index: {}]   ;;  %s2897_s5 = inlined_call_operand.vmem [shape: f32[1024,11], index: 5, kind: output, shape index: {0}]   ;;  %s2898_s6 = inlined_call_operand.vmem [shape: f32[1024,1], index: 6, kind: output, shape index: {1}]  }
   0x1   :  { %12 = sst [smem:[#allocation2]] %s2896_s4 }
   0x2 LB: > { %s1537_s24 = sadd.s32 4294967295, %s1801_s23   ;;  %p1541_p0 = scmp.ge.s32.totalorder %s1801_s23, 1  ;;  %s1801_s23 = sphi %s1841_s23, %s18_s23  }
   0x3   : > { %p217_p1 = scmp.lt.s32.totalorder %s1801_s23, 3 }
   0x5   : > { %p218_p2 = pnand %p1541_p0, %p217_p1 }
   0x6   : > { %s1542_s28 = sshll.u32 (!%p218_p2), %s1537_s24, 6  ;;  %s1316_s16 = sld [smem:[#allocation2]] (!%p218_p2) }
   0x7   : > { %221 = sbr.rel (%p218_p2) target bundleno = 484 (0x1e4), region = 40  ;;  %p253_p3 = scmp.lt.s32.totalorder (!%p218_p2), %s1542_s28, 127 }
   0xc   : > { %v335_v0 = vld [vmem:[%s2893_s1 + $0x8] sm:$0x7]  ;;  %vm536_vm0 = vcmask 1042432   ;;  %v334_v1 = vld [vmem:[%s2893_s1] sm:$0xff]  ;;  %s2920_s28 = smov (!%p253_p3, %s1542_s28), 127  ;;  %vm343_vm1 = vcmask 89088  }
   0xd   : > { %1683 = vmatprep.subr.msk.mxu0 %vm536_vm0, %v335_v0  ;;  %1783 = vmatprep.subr.msk.mxu1 %vm536_vm0, %v335_v0  ;;  %s1855_s29 = sshll.u32 %s2920_s28, 3  ;;  %vm1382_vm2 = vcmask 7168  }
   0xe   : > { %1684 = vmatpush3.msk.msra.mxu0 %vm536_vm0, %v335_v0  ;;  %1785 = vmatpush3.msk.msra.mxu1 %vm536_vm0, %v335_v0  ;;  %s1861_s8 = scalar_lea.vmem %s2892_s0, %s1855_s29  ;;  %s2002_s13 = scalar_lea.vmem %s2897_s5, %s1855_s29 }
   0xf   : > { %1685 = vmatprep.subr.mxu0 %v334_v1  ;;  %1784 = vmatprep.subr.mxu1 %v334_v1  ;;  %v270_v2 = vld [vmem:[%s1861_s8] sm:$0xff]  ;;  %v271_v4 = vld [vmem:[%s1861_s8 + $0x8] sm:$0xff]  ;;  %v272_v6 = vld [vmem:[%s1861_s8 + $0x10] sm:$0xff]  ;;  %s2695_s19 = scalar_lea.vmem %s2898_s6, %s1855_s29 }
  0x10   : > { %1686 = vmatpush3.msra.mxu0 %v334_v1  ;;  %1786 = vmatpush3.msra.mxu1 %v334_v1  ;;  %v302_v3 = vld [vmem:[%s1861_s8 + $0x100] sm:$0xff]  ;;  %v303_v5 = vld [vmem:[%s1861_s8 + $0x108] sm:$0xff]  ;;  %v304_v7 = vld [vmem:[%s1861_s8 + $0x110] sm:$0xff] }
  0x11   : > { %1687 = vmatprep.mubr.msk.f32.mxu0 %vm343_vm1, %v270_v2  ;;  %1735 = vmatprep.mubr.msk.f32.mxu1 %vm343_vm1, %v302_v3  ;;  %v273_v8 = vld [vmem:[%s1861_s8 + $0x18] sm:$0xff]  ;;  %v274_v10 = vld [vmem:[%s1861_s8 + $0x20] sm:$0xff]  ;;  %v275_v12 = vld [vmem:[%s1861_s8 + $0x28] sm:$0xff] }
  0x12   : > { %1688 = vmatmul.mubr.msk.f32.vlgmr.msra.gmra.mxu0 %vm343_vm1, %v271_v4  ;;  %1736 = vmatmul.mubr.msk.f32.vlgmr.msra.gmra.mxu1 %vm343_vm1, %v303_v5  ;;  %v305_v9 = vld [vmem:[%s1861_s8 + $0x118] sm:$0xff]  ;;  %v306_v11 = vld [vmem:[%s1861_s8 + $0x120] sm:$0xff]  ;;  %v307_v13 = vld [vmem:[%s1861_s8 + $0x128] sm:$0xff] }
  0x13   : > { %1690 = vmatprep.mubr.msk.f32.mxu0 %vm343_vm1, %v272_v6  ;;  %1738 = vmatprep.mubr.msk.f32.mxu1 %vm343_vm1, %v304_v7  ;;  %v276_v14 = vld [vmem:[%s1861_s8 + $0x30] sm:$0xff]  ;;  %v277_v16 = vld [vmem:[%s1861_s8 + $0x38] sm:$0xff]  ;;  %v278_v18 = vld [vmem:[%s1861_s8 + $0x40] sm:$0xff] }
  0x14   : > { %v308_v15 = vld [vmem:[%s1861_s8 + $0x130] sm:$0xff]  ;;  %v309_v17 = vld [vmem:[%s1861_s8 + $0x138] sm:$0xff]  ;;  %v310_v19 = vld [vmem:[%s1861_s8 + $0x140] sm:$0xff] }
  0x15   : > { %v279_v20 = vld [vmem:[%s1861_s8 + $0x48] sm:$0xff]  ;;  %v280_v22 = vld [vmem:[%s1861_s8 + $0x50] sm:$0xff]  ;;  %v281_v24 = vld [vmem:[%s1861_s8 + $0x58] sm:$0xff] }
  0x16   : > { %1691 = vmatmul.mubr.msk.f32.gmra.mxu0 %vm343_vm1, %v273_v8  ;;  %1739 = vmatmul.mubr.msk.f32.gmra.mxu1 %vm343_vm1, %v305_v9  ;;  %v311_v21 = vld [vmem:[%s1861_s8 + $0x148] sm:$0xff]  ;;  %v312_v23 = vld [vmem:[%s1861_s8 + $0x150] sm:$0xff]  ;;  %v313_v25 = vld [vmem:[%s1861_s8 + $0x158] sm:$0xff] }
  0x17   : > { %1693 = vmatprep.mubr.msk.f32.mxu0 %vm343_vm1, %v274_v10  ;;  %1741 = vmatprep.mubr.msk.f32.mxu1 %vm343_vm1, %v306_v11  ;;  %v282_v26 = vld [vmem:[%s1861_s8 + $0x60] sm:$0xff]  ;;  %v283_v28 = vld [vmem:[%s1861_s8 + $0x68] sm:$0xff]  ;;  %v284_v30 = vld [vmem:[%s1861_s8 + $0x70] sm:$0xff] }
  0x18   : > { %v314_v27 = vld [vmem:[%s1861_s8 + $0x160] sm:$0xff]  ;;  %v315_v29 = vld [vmem:[%s1861_s8 + $0x168] sm:$0xff]  ;;  %v316_v31 = vld [vmem:[%s1861_s8 + $0x170] sm:$0xff] }
  0x19   : > { %v285_v32 = vld [vmem:[%s1861_s8 + $0x78] sm:$0xff]  ;;  %v286_v34 = vld [vmem:[%s1861_s8 + $0x80] sm:$0xff]  ;;  %v287_v36 = vld [vmem:[%s1861_s8 + $0x88] sm:$0xff] }
  0x1a   : > { %1694 = vmatmul.mubr.msk.f32.gmra.mxu0 %vm343_vm1, %v275_v12  ;;  %1742 = vmatmul.mubr.msk.f32.gmra.mxu1 %vm343_vm1, %v307_v13  ;;  %v317_v33 = vld [vmem:[%s1861_s8 + $0x178] sm:$0xff]  ;;  %v318_v35 = vld [vmem:[%s1861_s8 + $0x180] sm:$0xff]  ;;  %v319_v37 = vld [vmem:[%s1861_s8 + $0x188] sm:$0xff] }
  0x1b   : > { %1696 = vmatprep.mubr.msk.f32.mxu0 %vm343_vm1, %v276_v14  ;;  %1744 = vmatprep.mubr.msk.f32.mxu1 %vm343_vm1, %v308_v15  ;;  %v288_v38 = vld [vmem:[%s1861_s8 + $0x90] sm:$0xff]  ;;  %v289_v40 = vld [vmem:[%s1861_s8 + $0x98] sm:$0xff]  ;;  %v290_v42 = vld [vmem:[%s1861_s8 + $0xa0] sm:$0xff] }
  0x1c   : > { %v320_v39 = vld [vmem:[%s1861_s8 + $0x190] sm:$0xff]  ;;  %v321_v41 = vld [vmem:[%s1861_s8 + $0x198] sm:$0xff]  ;;  %v322_v43 = vld [vmem:[%s1861_s8 + $0x1a0] sm:$0xff] }
  0x1d   : > { %v291_v44 = vld [vmem:[%s1861_s8 + $0xa8] sm:$0xff]  ;;  %v292_v46 = vld [vmem:[%s1861_s8 + $0xb0] sm:$0xff]  ;;  %v293_v48 = vld [vmem:[%s1861_s8 + $0xb8] sm:$0xff] }
  0x1e   : > { %1697 = vmatmul.mubr.msk.f32.gmra.mxu0 %vm343_vm1, %v277_v16  ;;  %1745 = vmatmul.mubr.msk.f32.gmra.mxu1 %vm343_vm1, %v309_v17  ;;  %v323_v45 = vld [vmem:[%s1861_s8 + $0x1a8] sm:$0xff]  ;;  %v324_v47 = vld [vmem:[%s1861_s8 + $0x1b0] sm:$0xff]  ;;  %v325_v49 = vld [vmem:[%s1861_s8 + $0x1b8] sm:$0xff] }
  0x1f   : > { %1699 = vmatprep.mubr.msk.f32.mxu0 %vm343_vm1, %v278_v18  ;;  %1747 = vmatprep.mubr.msk.f32.mxu1 %vm343_vm1, %v310_v19  ;;  %v294_v50 = vld [vmem:[%s1861_s8 + $0xc0] sm:$0xff]  ;;  %v295_v52 = vld [vmem:[%s1861_s8 + $0xc8] sm:$0xff]  ;;  %v296_v54 = vld [vmem:[%s1861_s8 + $0xd0] sm:$0xff] }
  0x20   : > { %v326_v51 = vld [vmem:[%s1861_s8 + $0x1c0] sm:$0xff]  ;;  %v327_v53 = vld [vmem:[%s1861_s8 + $0x1c8] sm:$0xff]  ;;  %v328_v55 = vld [vmem:[%s1861_s8 + $0x1d0] sm:$0xff] }
  0x21   : > { %v297_v56 = vld [vmem:[%s1861_s8 + $0xd8] sm:$0xff]  ;;  %v298_v58 = vld [vmem:[%s1861_s8 + $0xe0] sm:$0xff]  ;;  %v299_v60 = vld [vmem:[%s1861_s8 + $0xe8] sm:$0xff] }
  0x22   : > { %1700 = vmatmul.mubr.msk.f32.gmra.mxu0 %vm343_vm1, %v279_v20  ;;  %1748 = vmatmul.mubr.msk.f32.gmra.mxu1 %vm343_vm1, %v311_v21  ;;  %v329_v57 = vld [vmem:[%s1861_s8 + $0x1d8] sm:$0xff]  ;;  %v330_v59 = vld [vmem:[%s1861_s8 + $0x1e0] sm:$0xff]  ;;  %v331_v61 = vld [vmem:[%s1861_s8 + $0x1e8] sm:$0xff] }
  0x23   : > { %1702 = vmatprep.mubr.msk.f32.mxu0 %vm343_vm1, %v280_v22  ;;  %1750 = vmatprep.mubr.msk.f32.mxu1 %vm343_vm1, %v312_v23  ;;  %v300_v62 = vld [vmem:[%s1861_s8 + $0xf0] sm:$0xff]  ;;  %v301_v0 = vld [vmem:[%s1861_s8 + $0xf8] sm:$0xff]  ;;  %v1994_v2 = vld [vmem:[%s2894_s2] ss:$0 sm:$0xff] }
  0x24   : > { %v332_v63 = vld [vmem:[%s1861_s8 + $0x1f0] sm:$0xff]  ;;  %v333_v1 = vld [vmem:[%s1861_s8 + $0x1f8] sm:$0xff]  ;;  %v2009_v13 = vld [vmem:[%s2895_s3] ss:$0 sm:$0xff] }
  0x26   : > { %1703 = vmatmul.mubr.msk.f32.gmra.mxu0 %vm343_vm1, %v281_v24  ;;  %1751 = vmatmul.mubr.msk.f32.gmra.mxu1 %vm343_vm1, %v313_v25 }
  0x27   : > { %1705 = vmatprep.mubr.msk.f32.mxu0 %vm343_vm1, %v282_v26  ;;  %1753 = vmatprep.mubr.msk.f32.mxu1 %vm343_vm1, %v314_v27 }
  0x2a   : > { %1706 = vmatmul.mubr.msk.f32.gmra.mxu0 %vm343_vm1, %v283_v28  ;;  %1754 = vmatmul.mubr.msk.f32.gmra.mxu1 %vm343_vm1, %v315_v29 }
  0x2b   : > { %1708 = vmatprep.mubr.msk.f32.mxu0 %vm343_vm1, %v284_v30  ;;  %1756 = vmatprep.mubr.msk.f32.mxu1 %vm343_vm1, %v316_v31 }
  0x2e   : > { %1709 = vmatmul.mubr.msk.f32.gmra.mxu0 %vm343_vm1, %v285_v32  ;;  %1757 = vmatmul.mubr.msk.f32.gmra.mxu1 %vm343_vm1, %v317_v33 }
  0x2f   : > { %1711 = vmatprep.mubr.msk.f32.mxu0 %vm343_vm1, %v286_v34  ;;  %1759 = vmatprep.mubr.msk.f32.mxu1 %vm343_vm1, %v318_v35 }
  0x32   : > { %1712 = vmatmul.mubr.msk.f32.gmra.mxu0 %vm343_vm1, %v287_v36  ;;  %1760 = vmatmul.mubr.msk.f32.gmra.mxu1 %vm343_vm1, %v319_v37 }
  0x33   : > { %1714 = vmatprep.mubr.msk.f32.mxu0 %vm343_vm1, %v288_v38  ;;  %1762 = vmatprep.mubr.msk.f32.mxu1 %vm343_vm1, %v320_v39 }
  0x36   : > { %1715 = vmatmul.mubr.msk.f32.gmra.mxu0 %vm343_vm1, %v289_v40  ;;  %1763 = vmatmul.mubr.msk.f32.gmra.mxu1 %vm343_vm1, %v321_v41 }
  0x37   : > { %1717 = vmatprep.mubr.msk.f32.mxu0 %vm343_vm1, %v290_v42  ;;  %1765 = vmatprep.mubr.msk.f32.mxu1 %vm343_vm1, %v322_v43 }
  0x3a   : > { %1718 = vmatmul.mubr.msk.f32.gmra.mxu0 %vm343_vm1, %v291_v44  ;;  %1766 = vmatmul.mubr.msk.f32.gmra.mxu1 %vm343_vm1, %v323_v45 }
  0x3b   : > { %1720 = vmatprep.mubr.msk.f32.mxu0 %vm343_vm1, %v292_v46  ;;  %1768 = vmatprep.mubr.msk.f32.mxu1 %vm343_vm1, %v324_v47 }
  0x3e   : > { %1721 = vmatmul.mubr.msk.f32.gmra.mxu0 %vm343_vm1, %v293_v48  ;;  %1769 = vmatmul.mubr.msk.f32.gmra.mxu1 %vm343_vm1, %v325_v49 }
  0x3f   : > { %1723 = vmatprep.mubr.msk.f32.mxu0 %vm343_vm1, %v294_v50  ;;  %1771 = vmatprep.mubr.msk.f32.mxu1 %vm343_vm1, %v326_v51 }
  0x42   : > { %1724 = vmatmul.mubr.msk.f32.gmra.mxu0 %vm343_vm1, %v295_v52  ;;  %1772 = vmatmul.mubr.msk.f32.gmra.mxu1 %vm343_vm1, %v327_v53 }
  0x43   : > { %1726 = vmatprep.mubr.msk.f32.mxu0 %vm343_vm1, %v296_v54  ;;  %1774 = vmatprep.mubr.msk.f32.mxu1 %vm343_vm1, %v328_v55 }
  0x46   : > { %1727 = vmatmul.mubr.msk.f32.gmra.mxu0 %vm343_vm1, %v297_v56  ;;  %1775 = vmatmul.mubr.msk.f32.gmra.mxu1 %vm343_vm1, %v329_v57 }
  0x47   : > { %1729 = vmatprep.mubr.msk.f32.mxu0 %vm343_vm1, %v298_v58  ;;  %1777 = vmatprep.mubr.msk.f32.mxu1 %vm343_vm1, %v330_v59 }
  0x4a   : > { %1730 = vmatmul.mubr.msk.f32.gmra.mxu0 %vm343_vm1, %v299_v60  ;;  %1778 = vmatmul.mubr.msk.f32.gmra.mxu1 %vm343_vm1, %v331_v61 }
  0x4b   : > { %1732 = vmatprep.mubr.msk.f32.mxu0 %vm343_vm1, %v300_v62  ;;  %1780 = vmatprep.mubr.msk.f32.mxu1 %vm343_vm1, %v332_v63 }
  0x4e   : > { %1733 = vmatmul.mubr.msk.f32.gmra.mxu0 %vm343_vm1, %v301_v0  ;;  %1781 = vmatmul.mubr.msk.f32.gmra.mxu1 %vm343_vm1, %v333_v1 }
  0xd2   : > { %v1689_v3 = vpop.f32.mrf.mxu0  ;;  %v1737_v4 = vpop.f32.mrf.mxu1 }
  0xd3   : > { %v612_v5 = vadd.f32 %v1689_v3, %v1994_v2  ;;  %v772_v6 = vadd.f32 %v1737_v4, %v1994_v2 }
  0xd4   : > { %v606_v7 = vpop.f32.mrf.mxu0  ;;  %v766_v8 = vpop.f32.mrf.mxu1 }
  0xd5   : > { %v926_v9 = vmax.f32 %v612_v5, 0.0  ;;  %v958_v10 = vmax.f32 %v772_v6, 0.0  ;;  %v607_v11 = vadd.f32 %v1994_v2, %v606_v7  ;;  %v767_v12 = vadd.f32 %v1994_v2, %v766_v8 }
  0xd6   : > { %v1692_v14 = vpop.f32.mrf.mxu0  ;;  %v1740_v15 = vpop.f32.mrf.mxu1 }
  0xd7   : > { %990 = vst.msk [vmem:[%s2002_s13 + $0x8] sm:$0xff] %vm343_vm1, %v926_v9  ;;  %1022 = vst.msk [vmem:[%s2002_s13 + $0x108] sm:$0xff] %vm343_vm1, %v958_v10  ;;  %v925_v16 = vmax.f32 %v607_v11, 0.0  ;;  %v957_v17 = vmax.f32 %v767_v12, 0.0  ;;  %v622_v18 = vadd.f32 %v1692_v14, %v1994_v2  ;;  %v782_v19 = vadd.f32 %v1740_v15, %v1994_v2 }
  0xd8   : > { %v616_v20 = vpop.f32.mrf.mxu0  ;;  %v1093_v21 = vmul.f32 %v2009_v13, %v958_v10  ;;  %v776_v22 = vpop.f32.mrf.mxu1  ;;  %v1061_v23 = vmul.f32 %v2009_v13, %v926_v9 }
  0xd9   : > { %989 = vst.msk [vmem:[%s2002_s13] sm:$0xff] %vm343_vm1, %v925_v16  ;;  %1021 = vst.msk [vmem:[%s2002_s13 + $0x100] sm:$0xff] %vm343_vm1, %v957_v17  ;;  %v928_v24 = vmax.f32 %v622_v18, 0.0  ;;  %v617_v25 = vadd.f32 %v1994_v2, %v616_v20  ;;  %v960_v26 = vmax.f32 %v782_v19, 0.0  ;;  %v777_v27 = vadd.f32 %v1994_v2, %v776_v22 }
  0xda   : > { %v1223_v28 = vsel %vm343_vm1, %v1093_v21, 0.0  ;;  %v1127_v29 = vsel %vm343_vm1, %v1061_v23, 0.0  ;;  %v1695_v30 = vpop.f32.mrf.mxu0  ;;  %v1060_v31 = vmul.f32 %v2009_v13, %v925_v16  ;;  %v1743_v32 = vpop.f32.mrf.mxu1  ;;  %v1092_v47 = vmul.f32 %v2009_v13, %v957_v17 }
  0xdb   : > { %992 = vst.msk [vmem:[%s2002_s13 + $0x18] sm:$0xff] %vm343_vm1, %v928_v24  ;;  %v927_v33 = vmax.f32 %v617_v25, 0.0  ;;  %1024 = vst.msk [vmem:[%s2002_s13 + $0x118] sm:$0xff] %vm343_vm1, %v960_v26  ;;  %1224 = vadd.xlane.f32.xlu1 %v1223_v28  ;;  %v959_v34 = vmax.f32 %v777_v27, 0.0  ;;  %1128 = vadd.xlane.f32.xlu0 %v1127_v29  ;;  %v1063_v35 = vmul.f32 %v2009_v13, %v928_v24 }
  0xdc   : > { %v632_v36 = vadd.f32 %v1695_v30, %v1994_v2  ;;  %v626_v37 = vpop.f32.mrf.mxu0  ;;  %v2035_v38 = vadd.f32 %v1743_v32, %v1994_v2  ;;  %v1095_v39 = vmul.f32 %v2009_v13, %v960_v26  ;;  %v786_v40 = vpop.f32.mrf.mxu1  ;;  %v1124_v45 = vsel %vm343_vm1, %v1060_v31, 0.0 }
  0xdd   : > { %991 = vst.msk [vmem:[%s2002_s13 + $0x10] sm:$0xff] %vm343_vm1, %v927_v33  ;;  %1023 = vst.msk [vmem:[%s2002_s13 + $0x110] sm:$0xff] %vm343_vm1, %v959_v34  ;;  %v1133_v41 = vsel %vm343_vm1, %v1063_v35, 0.0  ;;  %v627_v43 = vadd.f32 %v1994_v2, %v626_v37  ;;  %v2045_v44 = vadd.f32 %v1994_v2, %v786_v40  ;;  %v1062_v58 = vmul.f32 %v2009_v13, %v927_v33 }
  0xde   : > { %v930_v42 = vmax.f32 %v632_v36, 0.0  ;;  %v962_v46 = vmax.f32 %v2035_v38, 0.0  ;;  %v1698_v48 = vpop.f32.mrf.mxu0  ;;  %v1746_v49 = vpop.f32.mrf.mxu1  ;;  %v1229_v54 = vsel %vm343_vm1, %v1095_v39, 0.0  ;;  %v1220_v61 = vsel %vm343_vm1, %v1092_v47, 0.0 }
  0xdf   : > { %1134 = vadd.xlane.f32.xlu1 %v1133_v41  ;;  %1125 = vadd.xlane.f32.xlu0 %v1124_v45  ;;  %v929_v50 = vmax.f32 %v627_v43, 0.0  ;;  %v961_v51 = vmax.f32 %v2045_v44, 0.0  ;;  %v2054_v52 = vadd.f32 %v1698_v48, %v1994_v2  ;;  %v2057_v53 = vadd.f32 %v1746_v49, %v1994_v2 }
  0xe0   : > { %994 = vst.msk [vmem:[%s2002_s13 + $0x28] sm:$0xff] %vm343_vm1, %v930_v42  ;;  %1026 = vst.msk [vmem:[%s2002_s13 + $0x128] sm:$0xff] %vm343_vm1, %v962_v46  ;;  %v636_v55 = vpop.f32.mrf.mxu0  ;;  %v796_v56 = vpop.f32.mrf.mxu1  ;;  %v1094_v62 = vmul.f32 %v2009_v13, %v959_v34  ;;  %v1130_v9 = vsel %vm343_vm1, %v1062_v58, 0.0  ;;  %v1065_v15 = vmul.f32 %v2009_v13, %v930_v42  ;;  %v1097_v26 = vmul.f32 %v2009_v13, %v962_v46 }
  0xe1   : > { %993 = vst.msk [vmem:[%s2002_s13 + $0x20] sm:$0xff] %vm343_vm1, %v929_v50  ;;  %1025 = vst.msk [vmem:[%s2002_s13 + $0x120] sm:$0xff] %vm343_vm1, %v961_v51  ;;  %v932_v57 = vmax.f32 %v2054_v52, 0.0  ;;  %v2069_v59 = vadd.f32 %v1994_v2, %v636_v55  ;;  %v964_v60 = vmax.f32 %v2057_v53, 0.0  ;;  %v2075_v63 = vadd.f32 %v1994_v2, %v796_v56 }
  0xe2   : > { %v1701_v0 = vpop.f32.mrf.mxu0  ;;  %v1749_v1 = vpop.f32.mrf.mxu1  ;;  %v1226_v14 = vsel %vm343_vm1, %v1094_v62, 0.0  ;;  %v1064_v16 = vmul.f32 %v2009_v13, %v929_v50  ;;  %v1139_v30 = vsel %vm343_vm1, %v1065_v15, 0.0  ;;  %v1096_v32 = vmul.f32 %v2009_v13, %v961_v51 }
  0xe3   : > { %1230 = vadd.xlane.f32.xlu1 %v1229_v54  ;;  %1221 = vadd.xlane.f32.xlu0 %v1220_v61  ;;  %996 = vst.msk [vmem:[%s2002_s13 + $0x38] sm:$0xff] %vm343_vm1, %v932_v57  ;;  %v931_v3 = vmax.f32 %v2069_v59, 0.0  ;;  %1028 = vst.msk [vmem:[%s2002_s13 + $0x138] sm:$0xff] %vm343_vm1, %v964_v60  ;;  %v2087_v4 = vadd.f32 %v1701_v0, %v1994_v2  ;;  %v2090_v5 = vadd.f32 %v1749_v1, %v1994_v2 }
  0xe4   : > { %v963_v6 = vmax.f32 %v2075_v63, 0.0  ;;  %v646_v7 = vpop.f32.mrf.mxu0  ;;  %v806_v8 = vpop.f32.mrf.mxu1  ;;  %v1136_v31 = vsel %vm343_vm1, %v1064_v16, 0.0  ;;  %v1235_v42 = vsel %vm343_vm1, %v1097_v26, 0.0  ;;  %v1232_v46 = vsel %vm343_vm1, %v1096_v32, 0.0 }
  0xe5   : > { %995 = vst.msk [vmem:[%s2002_s13 + $0x30] sm:$0xff] %vm343_vm1, %v931_v3  ;;  %v934_v10 = vmax.f32 %v2087_v4, 0.0  ;;  %v2098_v11 = vadd.f32 %v1994_v2, %v646_v7  ;;  %v966_v12 = vmax.f32 %v2090_v5, 0.0  ;;  %v2109_v17 = vadd.f32 %v1994_v2, %v806_v8 }
  0xe6   : > { %1027 = vst.msk [vmem:[%s2002_s13 + $0x130] sm:$0xff] %vm343_vm1, %v963_v6  ;;  %v1704_v18 = vpop.f32.mrf.mxu0  ;;  %v1752_v19 = vpop.f32.mrf.mxu1  ;;  %v1067_v47 = vmul.f32 %v2009_v13, %v932_v57  ;;  %v1066_v48 = vmul.f32 %v2009_v13, %v931_v3  ;;  %v1099_v59 = vmul.f32 %v2009_v13, %v964_v60  ;;  %v1098_v53 = vmul.f32 %v2009_v13, %v963_v6 }
  0xe7   : > { %1131 = vadd.xlane.f32.xlu1 %v1130_v9  ;;  %1227 = vadd.xlane.f32.xlu0 %v1226_v14  ;;  %998 = vst.msk [vmem:[%s2002_s13 + $0x48] sm:$0xff] %vm343_vm1, %v934_v10  ;;  %v933_v20 = vmax.f32 %v2098_v11, 0.0  ;;  %1030 = vst.msk [vmem:[%s2002_s13 + $0x148] sm:$0xff] %vm343_vm1, %v966_v12  ;;  %v2121_v21 = vadd.f32 %v1704_v18, %v1994_v2  ;;  %v2124_v22 = vadd.f32 %v1752_v19, %v1994_v2 }
  0xe8   : > { %v965_v23 = vmax.f32 %v2109_v17, 0.0  ;;  %v656_v24 = vpop.f32.mrf.mxu0  ;;  %v816_v25 = vpop.f32.mrf.mxu1  ;;  %v1145_v1 = vsel %vm343_vm1, %v1067_v47, 0.0  ;;  %v1142_v3 = vsel %vm343_vm1, %v1066_v48, 0.0  ;;  %v1241_v18 = vsel %vm343_vm1, %v1099_v59, 0.0 }
  0xe9   : > { %997 = vst.msk [vmem:[%s2002_s13 + $0x40] sm:$0xff] %vm343_vm1, %v933_v20  ;;  %v936_v27 = vmax.f32 %v2121_v21, 0.0  ;;  %v2134_v28 = vadd.f32 %v1994_v2, %v656_v24  ;;  %v968_v29 = vmax.f32 %v2124_v22, 0.0  ;;  %v2145_v33 = vadd.f32 %v1994_v2, %v816_v25 }
  0xea   : > { %1029 = vst.msk [vmem:[%s2002_s13 + $0x140] sm:$0xff] %vm343_vm1, %v965_v23  ;;  %v1707_v34 = vpop.f32.mrf.mxu0  ;;  %v1755_v35 = vpop.f32.mrf.mxu1  ;;  %v1238_v26 = vsel %vm343_vm1, %v1098_v53, 0.0  ;;  %v1100_v5 = vmul.f32 %v2009_v13, %v965_v23 }
  0xeb   : > { %1140 = vadd.xlane.f32.xlu1 %v1139_v30  ;;  %1137 = vadd.xlane.f32.xlu0 %v1136_v31  ;;  %1000 = vst.msk [vmem:[%s2002_s13 + $0x58] sm:$0xff] %vm343_vm1, %v936_v27  ;;  %v935_v36 = vmax.f32 %v2134_v28, 0.0  ;;  %1032 = vst.msk [vmem:[%s2002_s13 + $0x158] sm:$0xff] %vm343_vm1, %v968_v29  ;;  %v2157_v37 = vadd.f32 %v1707_v34, %v1994_v2  ;;  %v2160_v38 = vadd.f32 %v1755_v35, %v1994_v2 }
  0xec   : > { %v967_v39 = vmax.f32 %v2145_v33, 0.0  ;;  %v666_v40 = vpop.f32.mrf.mxu0  ;;  %v826_v41 = vpop.f32.mrf.mxu1  ;;  %v1069_v30 = vmul.f32 %v2009_v13, %v934_v10  ;;  %v1068_v31 = vmul.f32 %v2009_v13, %v933_v20 }
  0xed   : > { %999 = vst.msk [vmem:[%s2002_s13 + $0x50] sm:$0xff] %vm343_vm1, %v935_v36  ;;  %v938_v43 = vmax.f32 %v2157_v37, 0.0  ;;  %v2170_v44 = vadd.f32 %v1994_v2, %v666_v40  ;;  %v970_v45 = vmax.f32 %v2160_v38, 0.0  ;;  %v2183_v49 = vadd.f32 %v1994_v2, %v826_v41 }
  0xee   : > { %1031 = vst.msk [vmem:[%s2002_s13 + $0x150] sm:$0xff] %vm343_vm1, %v967_v39  ;;  %v1710_v50 = vpop.f32.mrf.mxu0  ;;  %v1758_v51 = vpop.f32.mrf.mxu1  ;;  %v1102_v22 = vmul.f32 %v2009_v13, %v967_v39 }
  0xef   : > { %1236 = vadd.xlane.f32.xlu1 %v1235_v42  ;;  %1233 = vadd.xlane.f32.xlu0 %v1232_v46  ;;  %1002 = vst.msk [vmem:[%s2002_s13 + $0x68] sm:$0xff] %vm343_vm1, %v938_v43  ;;  %v937_v52 = vmax.f32 %v2170_v44, 0.0  ;;  %1034 = vst.msk [vmem:[%s2002_s13 + $0x168] sm:$0xff] %vm343_vm1, %v970_v45  ;;  %v2195_v54 = vadd.f32 %v1710_v50, %v1994_v2  ;;  %v2198_v55 = vadd.f32 %v1758_v51, %v1994_v2 }
  0xf0   : > { %v969_v56 = vmax.f32 %v2183_v49, 0.0  ;;  %v676_v57 = vpop.f32.mrf.mxu0  ;;  %v836_v58 = vpop.f32.mrf.mxu1  ;;  %v1101_v42 = vmul.f32 %v2009_v13, %v966_v12  ;;  %v1151_v50 = vsel %vm343_vm1, %v1069_v30, 0.0  ;;  %v1148_v51 = vsel %vm343_vm1, %v1068_v31, 0.0 }
  0xf1   : > { %1001 = vst.msk [vmem:[%s2002_s13 + $0x60] sm:$0xff] %vm343_vm1, %v937_v52  ;;  %v940_v61 = vmax.f32 %v2195_v54, 0.0  ;;  %v2210_v62 = vadd.f32 %v1994_v2, %v676_v57  ;;  %v972_v0 = vmax.f32 %v2198_v55, 0.0  ;;  %v2223_v60 = vadd.f32 %v1994_v2, %v836_v58 }
  0xf2   : > { %1033 = vst.msk [vmem:[%s2002_s13 + $0x160] sm:$0xff] %vm343_vm1, %v969_v56  ;;  %v1713_v7 = vpop.f32.mrf.mxu0  ;;  %v1761_v8 = vpop.f32.mrf.mxu1  ;;  %v1070_v30 = vmul.f32 %v2009_v13, %v935_v36  ;;  %v1104_v38 = vmul.f32 %v2009_v13, %v969_v56 }
  0xf3   : > { %1146 = vadd.xlane.f32.xlu1 %v1145_v1  ;;  %1143 = vadd.xlane.f32.xlu0 %v1142_v3  ;;  %1004 = vst.msk [vmem:[%s2002_s13 + $0x78] sm:$0xff] %vm343_vm1, %v940_v61  ;;  %v939_v63 = vmax.f32 %v2210_v62, 0.0  ;;  %1036 = vst.msk [vmem:[%s2002_s13 + $0x178] sm:$0xff] %vm343_vm1, %v972_v0  ;;  %v2235_v6 = vadd.f32 %v1713_v7, %v1994_v2  ;;  %v2238_v9 = vadd.f32 %v1761_v8, %v1994_v2 }
  0xf4   : > { %v971_v14 = vmax.f32 %v2223_v60, 0.0  ;;  %v686_v15 = vpop.f32.mrf.mxu0  ;;  %v846_v16 = vpop.f32.mrf.mxu1  ;;  %v1247_v7 = vsel %vm343_vm1, %v1101_v42, 0.0  ;;  %v1103_v42 = vmul.f32 %v2009_v13, %v968_v29 }
  0xf5   : > { %1003 = vst.msk [vmem:[%s2002_s13 + $0x70] sm:$0xff] %vm343_vm1, %v939_v63  ;;  %v942_v19 = vmax.f32 %v2235_v6, 0.0  ;;  %v2248_v24 = vadd.f32 %v1994_v2, %v686_v15  ;;  %v974_v25 = vmax.f32 %v2238_v9, 0.0  ;;  %v2263_v32 = vadd.f32 %v1994_v2, %v846_v16 }
  0xf6   : > { %1035 = vst.msk [vmem:[%s2002_s13 + $0x170] sm:$0xff] %vm343_vm1, %v971_v14  ;;  %v1716_v34 = vpop.f32.mrf.mxu0  ;;  %v1764_v35 = vpop.f32.mrf.mxu1  ;;  %v1106_v55 = vmul.f32 %v2009_v13, %v971_v14 }
  0xf7   : > { %1242 = vadd.xlane.f32.xlu1 %v1241_v18  ;;  %1239 = vadd.xlane.f32.xlu0 %v1238_v26  ;;  %1006 = vst.msk [vmem:[%s2002_s13 + $0x88] sm:$0xff] %vm343_vm1, %v942_v19  ;;  %v941_v4 = vmax.f32 %v2248_v24, 0.0  ;;  %1038 = vst.msk [vmem:[%s2002_s13 + $0x188] sm:$0xff] %vm343_vm1, %v974_v25  ;;  %v2275_v10 = vadd.f32 %v1716_v34, %v1994_v2  ;;  %v2278_v11 = vadd.f32 %v1764_v35, %v1994_v2 }
  0xf8   : > { %v973_v20 = vmax.f32 %v2263_v32, 0.0  ;;  %v696_v40 = vpop.f32.mrf.mxu0  ;;  %v856_v41 = vpop.f32.mrf.mxu1  ;;  %v1244_v18 = vsel %vm343_vm1, %v1100_v5, 0.0  ;;  %v1071_v26 = vmul.f32 %v2009_v13, %v936_v27  ;;  %v1109_v6 = vmul.f32 %v2009_v13, %v974_v25 }
  0xf9   : > { %1005 = vst.msk [vmem:[%s2002_s13 + $0x80] sm:$0xff] %vm343_vm1, %v941_v4  ;;  %v944_v46 = vmax.f32 %v2275_v10, 0.0  ;;  %v2290_v47 = vadd.f32 %v1994_v2, %v696_v40  ;;  %v976_v48 = vmax.f32 %v2278_v11, 0.0  ;;  %v2303_v12 = vadd.f32 %v1994_v2, %v856_v41 }
  0xfa   : > { %1037 = vst.msk [vmem:[%s2002_s13 + $0x180] sm:$0xff] %vm343_vm1, %v973_v20  ;;  %v1719_v57 = vpop.f32.mrf.mxu0  ;;  %v1767_v58 = vpop.f32.mrf.mxu1  ;;  %v1271_v24 = vsel %vm343_vm1, %v1109_v6, 0.0 }
  0xfb   : > { %1152 = vadd.xlane.f32.xlu1 %v1151_v50  ;;  %1149 = vadd.xlane.f32.xlu0 %v1148_v51  ;;  %1008 = vst.msk [vmem:[%s2002_s13 + $0x98] sm:$0xff] %vm343_vm1, %v944_v46  ;;  %v943_v17 = vmax.f32 %v2290_v47, 0.0  ;;  %1040 = vst.msk [vmem:[%s2002_s13 + $0x198] sm:$0xff] %vm343_vm1, %v976_v48  ;;  %v2315_v23 = vadd.f32 %v1719_v57, %v1994_v2  ;;  %v2318_v59 = vadd.f32 %v1767_v58, %v1994_v2 }
  0xfc   : > { %v975_v1 = vmax.f32 %v2303_v12, 0.0  ;;  %v706_v3 = vpop.f32.mrf.mxu0  ;;  %v866_v53 = vpop.f32.mrf.mxu1  ;;  %v1157_v57 = vsel %vm343_vm1, %v1071_v26, 0.0  ;;  %v1154_v58 = vsel %vm343_vm1, %v1070_v30, 0.0 }
  0xfd   : > { %1007 = vst.msk [vmem:[%s2002_s13 + $0x90] sm:$0xff] %vm343_vm1, %v943_v17  ;;  %v946_v8 = vmax.f32 %v2315_v23, 0.0  ;;  %v2328_v15 = vadd.f32 %v1994_v2, %v706_v3  ;;  %v978_v16 = vmax.f32 %v2318_v59, 0.0  ;;  %v2343_v31 = vadd.f32 %v1994_v2, %v866_v53 }
  0xfe   : > { %1039 = vst.msk [vmem:[%s2002_s13 + $0x190] sm:$0xff] %vm343_vm1, %v975_v1  ;;  %v1722_v34 = vpop.f32.mrf.mxu0  ;;  %v1770_v35 = vpop.f32.mrf.mxu1  ;;  %v1078_v9 = vmul.f32 %v2009_v13, %v943_v17  ;;  %v1110_v10 = vmul.f32 %v2009_v13, %v975_v1 }
  0xff   : > { %1248 = vadd.xlane.f32.xlu1 %v1247_v7  ;;  %1245 = vadd.xlane.f32.xlu0 %v1244_v18  ;;  %1010 = vst.msk [vmem:[%s2002_s13 + $0xa8] sm:$0xff] %vm343_vm1, %v946_v8  ;;  %v945_v21 = vmax.f32 %v2328_v15, 0.0  ;;  %1042 = vst.msk [vmem:[%s2002_s13 + $0x1a8] sm:$0xff] %vm343_vm1, %v978_v16  ;;  %v2355_v27 = vadd.f32 %v1722_v34, %v1994_v2  ;;  %v2358_v28 = vadd.f32 %v1770_v35, %v1994_v2 }
 0x100   : > { %v977_v36 = vmax.f32 %v2343_v31, 0.0  ;;  %v716_v40 = vpop.f32.mrf.mxu0  ;;  %v876_v41 = vpop.f32.mrf.mxu1  ;;  %v1253_v34 = vsel %vm343_vm1, %v1103_v42, 0.0  ;;  %v1072_v42 = vmul.f32 %v2009_v13, %v937_v52  ;;  %v1178_v32 = vsel %vm343_vm1, %v1078_v9, 0.0 }
 0x101   : > { %1009 = vst.msk [vmem:[%s2002_s13 + $0xa0] sm:$0xff] %vm343_vm1, %v945_v21  ;;  %v948_v50 = vmax.f32 %v2355_v27, 0.0  ;;  %v2370_v51 = vadd.f32 %v1994_v2, %v716_v40  ;;  %v980_v5 = vmax.f32 %v2358_v28, 0.0  ;;  %v2383_v29 = vadd.f32 %v1994_v2, %v876_v41 }
 0x102   : > { %1041 = vst.msk [vmem:[%s2002_s13 + $0x1a0] sm:$0xff] %vm343_vm1, %v977_v36  ;;  %v1725_v3 = vpop.f32.mrf.mxu0  ;;  %v1773_v53 = vpop.f32.mrf.mxu1  ;;  %v1274_v47 = vsel %vm343_vm1, %v1110_v10, 0.0  ;;  %v1081_v17 = vmul.f32 %v2009_v13, %v946_v8  ;;  %v1080_v11 = vmul.f32 %v2009_v13, %v945_v21  ;;  %v1113_v1 = vmul.f32 %v2009_v13, %v978_v16 }
 0x103   : > { %1158 = vadd.xlane.f32.xlu1 %v1157_v57  ;;  %1155 = vadd.xlane.f32.xlu0 %v1154_v58  ;;  %1012 = vst.msk [vmem:[%s2002_s13 + $0xb8] sm:$0xff] %vm343_vm1, %v948_v50  ;;  %v947_v33 = vmax.f32 %v2370_v51, 0.0  ;;  %1044 = vst.msk [vmem:[%s2002_s13 + $0x1b8] sm:$0xff] %vm343_vm1, %v980_v5  ;;  %v2395_v39 = vadd.f32 %v1725_v3, %v1994_v2  ;;  %v2398_v7 = vadd.f32 %v1773_v53, %v1994_v2 }
 0x104   : > { %v2906_v18 = vmax.f32 %v2383_v29, 0.0  ;;  %v726_v26 = vpop.f32.mrf.mxu0  ;;  %v886_v30 = vpop.f32.mrf.mxu1  ;;  %v1250_v57 = vsel %vm343_vm1, %v1102_v22, 0.0  ;;  %v1073_v58 = vmul.f32 %v2009_v13, %v938_v43  ;;  %v1184_v12 = vsel %vm343_vm1, %v1080_v11, 0.0 }
 0x105   : > { %1011 = vst.msk [vmem:[%s2002_s13 + $0xb0] sm:$0xff] %vm343_vm1, %v947_v33  ;;  %v2900_v35 = vmax.f32 %v2395_v39, 0.0  ;;  %v2408_v40 = vadd.f32 %v1994_v2, %v726_v26  ;;  %v2899_v41 = vmax.f32 %v2398_v7, 0.0  ;;  %v2423_v3 = vadd.f32 %v1994_v2, %v886_v30 }
 0x106   : > { %1043 = vst.msk [vmem:[%s2002_s13 + $0x1b0] sm:$0xff] %vm343_vm1, %v2906_v18  ;;  %v1728_v53 = vpop.f32.mrf.mxu0  ;;  %v1776_v26 = vpop.f32.mrf.mxu1  ;;  %v1112_v23 = vmul.f32 %v2009_v13, %v977_v36  ;;  %v1283_v8 = vsel %vm343_vm1, %v1113_v1, 0.0  ;;  %v1083_v21 = vmul.f32 %v2009_v13, %v948_v50  ;;  %v1082_v59 = vmul.f32 %v2009_v13, %v947_v33 }
 0x107   : > { %1254 = vadd.xlane.f32.xlu1 %v1253_v34  ;;  %1251 = vadd.xlane.f32.xlu0 %v1250_v57  ;;  %1014 = vst.msk [vmem:[%s2002_s13 + $0xc8] sm:$0xff] %vm343_vm1, %v2900_v35  ;;  %v2901_v37 = vmax.f32 %v2408_v40, 0.0  ;;  %1046 = vst.msk [vmem:[%s2002_s13 + $0x1c8] sm:$0xff] %vm343_vm1, %v2899_v41  ;;  %v2435_v43 = vadd.f32 %v1728_v53, %v1994_v2  ;;  %v2438_v44 = vadd.f32 %v1776_v26, %v1994_v2 }
 0x108   : > { %v2904_v52 = vmax.f32 %v2423_v3, 0.0  ;;  %v736_v22 = vpop.f32.mrf.mxu0  ;;  %v896_v30 = vpop.f32.mrf.mxu1  ;;  %v1105_v34 = vmul.f32 %v2009_v13, %v970_v45  ;;  %v1163_v41 = vsel %vm343_vm1, %v1073_v58, 0.0  ;;  %v1160_v35 = vsel %vm343_vm1, %v1072_v42, 0.0 }
 0x109   : > { %1013 = vst.msk [vmem:[%s2002_s13 + $0xc0] sm:$0xff] %vm343_vm1, %v2901_v37  ;;  %v2903_v57 = vmax.f32 %v2435_v43, 0.0  ;;  %v2450_v53 = vadd.f32 %v1994_v2, %v736_v22  ;;  %v2902_v26 = vmax.f32 %v2438_v44, 0.0  ;;  %v2463_v45 = vadd.f32 %v1994_v2, %v896_v30 }
 0x10a   : > { %1045 = vst.msk [vmem:[%s2002_s13 + $0x1c0] sm:$0xff] %vm343_vm1, %v2904_v52  ;;  %v1731_v22 = vpop.f32.mrf.mxu0  ;;  %v1779_v37 = vpop.f32.mrf.mxu1  ;;  %v1259_v30 = vsel %vm343_vm1, %v1105_v34, 0.0  ;;  %v1075_v52 = vmul.f32 %v2009_v13, %v940_v61  ;;  %v1074_v34 = vmul.f32 %v2009_v13, %v939_v63  ;;  %v1280_v15 = vsel %vm343_vm1, %v1112_v23, 0.0 }
 0x10b   : > { %1164 = vadd.xlane.f32.xlu1 %v1163_v41  ;;  %1161 = vadd.xlane.f32.xlu0 %v1160_v35  ;;  %1016 = vst.msk [vmem:[%s2002_s13 + $0xd8] sm:$0xff] %vm343_vm1, %v2903_v57  ;;  %v2905_v49 = vmax.f32 %v2450_v53, 0.0  ;;  %1048 = vst.msk [vmem:[%s2002_s13 + $0x1d8] sm:$0xff] %vm343_vm1, %v2902_v26  ;;  %v2475_v56 = vadd.f32 %v1731_v22, %v1994_v2  ;;  %v2478_v58 = vadd.f32 %v1779_v37, %v1994_v2 }
 0x10c   : > { %v983_v41 = vmax.f32 %v2463_v45, 0.0  ;;  %v746_v35 = vpop.f32.mrf.mxu0  ;;  %v906_v42 = vpop.f32.mrf.mxu1  ;;  %v1256_v57 = vsel %vm343_vm1, %v1104_v38, 0.0  ;;  %v1193_v16 = vsel %vm343_vm1, %v1083_v21, 0.0  ;;  %v1190_v31 = vsel %vm343_vm1, %v1082_v59, 0.0 }
 0x10d   : > { %1015 = vst.msk [vmem:[%s2002_s13 + $0xd0] sm:$0xff] %vm343_vm1, %v2905_v49  ;;  %v2908_v26 = vmax.f32 %v2475_v56, 0.0  ;;  %v2488_v22 = vadd.f32 %v1994_v2, %v746_v35  ;;  %v2907_v37 = vmax.f32 %v2478_v58, 0.0  ;;  %v2503_v35 = vadd.f32 %v1994_v2, %v906_v42 }
 0x10e   : > { %1047 = vst.msk [vmem:[%s2002_s13 + $0x1d0] sm:$0xff] %vm343_vm1, %v983_v41  ;;  %v1734_v49 = vpop.f32.mrf.mxu0  ;;  %v1782_v18 = vpop.f32.mrf.mxu1  ;;  %v1107_v42 = vmul.f32 %v2009_v13, %v972_v0  ;;  %v1115_v36 = vmul.f32 %v2009_v13, %v980_v5  ;;  %v2910_v33 = vmax.f32 %v2395_v39, 0.0  ;;  %v2915_v6 = vmax.f32 %v2450_v53, 0.0 }
 0x10f   : > { %1260 = vadd.xlane.f32.xlu1 %v1259_v30  ;;  %1257 = vadd.xlane.f32.xlu0 %v1256_v57  ;;  %1018 = vst.msk [vmem:[%s2002_s13 + $0xe8] sm:$0xff] %vm343_vm1, %v2908_v26  ;;  %v953_v54 = vmax.f32 %v2488_v22, 0.0  ;;  %1050 = vst.msk [vmem:[%s2002_s13 + $0x1e8] sm:$0xff] %vm343_vm1, %v2907_v37  ;;  %v2515_v61 = vadd.f32 %v1734_v49, %v1994_v2  ;;  %v922_v62 = vadd.f32 %v1782_v18, %v1994_v2 }
 0x110   : > { %v985_v63 = vmax.f32 %v2503_v35, 0.0  ;;  %v756_v57 = vpop.f32.mrf.mxu0  ;;  %v916_v38 = vpop.f32.mrf.mxu1  ;;  %v1169_v37 = vsel %vm343_vm1, %v1075_v52, 0.0  ;;  %v1166_v26 = vsel %vm343_vm1, %v1074_v34, 0.0  ;;  %v1076_v34 = vmul.f32 %v2009_v13, %v941_v4 }
 0x111   : > { %1017 = vst.msk [vmem:[%s2002_s13 + $0xe0] sm:$0xff] %vm343_vm1, %v953_v54  ;;  %v956_v49 = vmax.f32 %v2515_v61, 0.0  ;;  %v2528_v30 = vadd.f32 %v1994_v2, %v756_v57  ;;  %v988_v18 = vmax.f32 %v922_v62, 0.0  ;;  %v2540_v0 = vadd.f32 %v1994_v2, %v916_v38 }
 0x112   : > { %1049 = vst.msk [vmem:[%s2002_s13 + $0x1e0] sm:$0xff] %vm343_vm1, %v985_v63  ;;  %v1265_v2 = vsel %vm343_vm1, %v1107_v42, 0.0  ;;  %v1172_v57 = vsel %vm343_vm1, %v1076_v34, 0.0  ;;  %v1079_v38 = vmul.f32 %v2009_v13, %v944_v46  ;;  %v2909_v42 = vmax.f32 %v2383_v29, 0.0 }
 0x113   : > { %1170 = vadd.xlane.f32.xlu1 %v1169_v37  ;;  %1167 = vadd.xlane.f32.xlu0 %v1166_v26  ;;  %1020 = vst.msk [vmem:[%s2002_s13 + $0xf8] sm:$0xff] %vm343_vm1, %v956_v49  ;;  %v955_v52 = vmax.f32 %v2528_v30, 0.0  ;;  %1052 = vst.msk [vmem:[%s2002_s13 + $0x1f8] sm:$0xff] %vm343_vm1, %v988_v18  ;;  %v2550_v60 = vmul.f32 %v2009_v13, %v988_v18  ;;  %v987_v14 = vmax.f32 %v2540_v0, 0.0  ;;  %v1262_v26 = vsel %vm343_vm1, %v1106_v55, 0.0 }
 0x114   : > { %v1077_v37 = vmul.f32 %v2009_v13, %v942_v19  ;;  %v1108_v19 = vmul.f32 %v2009_v13, %v973_v20  ;;  %v1181_v25 = vsel %vm343_vm1, %v1079_v38, 0.0  ;;  %v1111_v20 = vmul.f32 %v2009_v13, %v976_v48 }
 0x115   : > { %1019 = vst.msk [vmem:[%s2002_s13 + $0xf0] sm:$0xff] %vm343_vm1, %v955_v52  ;;  %1051 = vst.msk [vmem:[%s2002_s13 + $0x1f0] sm:$0xff] %vm343_vm1, %v987_v14  ;;  %v1187_v48 = vsel %vm343_vm1, %v1081_v17, 0.0  ;;  %v1114_v27 = vmul.f32 %v2009_v13, %v2909_v42  ;;  %v1289_v50 = vsel %vm343_vm1, %v1115_v36, 0.0  ;;  %v1085_v18 = vmul.f32 %v2009_v13, %v2910_v33 }
 0x116   : > { %v1175_v62 = vsel %vm343_vm1, %v1077_v37, 0.0  ;;  %v1268_v4 = vsel %vm343_vm1, %v1108_v19, 0.0  ;;  %v1277_v46 = vsel %vm343_vm1, %v1111_v20, 0.0  ;;  %v2911_v55 = vmax.f32 %v2408_v40, 0.0 }
 0x117   : > { %1266 = vadd.xlane.f32.xlu1 %v1265_v2  ;;  %1263 = vadd.xlane.f32.xlu0 %v1262_v26  ;;  %v1286_v51 = vsel %vm343_vm1, %v1114_v27, 0.0  ;;  %v1199_v5 = vsel %vm343_vm1, %v1085_v18, 0.0  ;;  %v2912_v2 = vmax.f32 %v2398_v7, 0.0  ;;  %v2913_v37 = vmax.f32 %v2423_v3, 0.0 }
 0x118   : > { %v1084_v28 = vmul.f32 %v2009_v13, %v2911_v55  ;;  %v1086_v7 = vmul.f32 %v2009_v13, %v2915_v6  ;;  %v2917_v9 = vmax.f32 %v2475_v56, 0.0  ;;  %v1120_v56 = vmul.f32 %v2009_v13, %v985_v63 }
 0x119   : > { %v1117_v26 = vmul.f32 %v2009_v13, %v2912_v2  ;;  %v1116_v39 = vmul.f32 %v2009_v13, %v2913_v37  ;;  %v1091_v10 = vmul.f32 %v2009_v13, %v956_v49  ;;  %v1313_v61 = vsel %vm343_vm1, %v2550_v60, 0.0 }
 0x11a   : > { %v1196_v29 = vsel %vm343_vm1, %v1084_v28, 0.0  ;;  %v1202_v19 = vsel %vm343_vm1, %v1086_v7, 0.0  ;;  %v2689_v30 = vstv %s1316_s16 }
 0x11b   : > { %1176 = vadd.xlane.f32.xlu1 %v1175_v62  ;;  %1173 = vadd.xlane.f32.xlu0 %v1172_v57  ;;  %v1295_v40 = vsel %vm343_vm1, %v1117_v26, 0.0  ;;  %v1292_v34 = vsel %vm343_vm1, %v1116_v39, 0.0  ;;  %v2914_v62 = vmax.f32 %v2435_v43, 0.0  ;;  %v1118_v43 = vmul.f32 %v2009_v13, %v983_v41 }
 0x11c   : > { %v1217_v35 = vsel %vm343_vm1, %v1091_v10, 0.0 }
 0x11d   : > { %v1087_v57 = vmul.f32 %v2009_v13, %v2914_v62  ;;  %v1298_v38 = vsel %vm343_vm1, %v1118_v43, 0.0 }
 0x11f   : > { %1272 = vadd.xlane.f32.xlu1 %v1271_v24  ;;  %1269 = vadd.xlane.f32.xlu0 %v1268_v4  ;;  %v1205_v3 = vsel %vm343_vm1, %v1087_v57, 0.0  ;;  %v2916_v24 = vmax.f32 %v2438_v44, 0.0  ;;  %v1088_v44 = vmul.f32 %v2009_v13, %v953_v54  ;;  %v1304_v54 = vsel %vm343_vm1, %v1120_v56, 0.0 }
 0x121   : > { %v1119_v4 = vmul.f32 %v2009_v13, %v2916_v24  ;;  %v1208_v41 = vsel %vm343_vm1, %v1088_v44, 0.0 }
 0x123   : > { %1182 = vadd.xlane.f32.xlu1 %v1181_v25  ;;  %1179 = vadd.xlane.f32.xlu0 %v1178_v32  ;;  %v1301_v53 = vsel %vm343_vm1, %v1119_v4, 0.0  ;;  %v1089_v25 = vmul.f32 %v2009_v13, %v2917_v9  ;;  %v2918_v32 = vmax.f32 %v2478_v58, 0.0  ;;  %v1090_v58 = vmul.f32 %v2009_v13, %v955_v52 }
 0x125   : > { %v1211_v45 = vsel %vm343_vm1, %v1089_v25, 0.0  ;;  %v1121_v20 = vmul.f32 %v2009_v13, %v2918_v32  ;;  %v1214_v63 = vsel %vm343_vm1, %v1090_v58, 0.0 }
 0x127   : > { %1278 = vadd.xlane.f32.xlu1 %v1277_v46  ;;  %1275 = vadd.xlane.f32.xlu0 %v1274_v47  ;;  %v1307_v22 = vsel %vm343_vm1, %v1121_v20, 0.0  ;;  %v1122_v46 = vmul.f32 %v2009_v13, %v987_v14 }
 0x129   : > { %v1310_v49 = vsel %vm343_vm1, %v1122_v46, 0.0 }
 0x12b   : > { %1188 = vadd.xlane.f32.xlu1 %v1187_v48  ;;  %1185 = vadd.xlane.f32.xlu0 %v1184_v12 }
 0x12f   : > { %1284 = vadd.xlane.f32.xlu1 %v1283_v8  ;;  %1281 = vadd.xlane.f32.xlu0 %v1280_v15 }
 0x133   : > { %1194 = vadd.xlane.f32.xlu1 %v1193_v16  ;;  %1191 = vadd.xlane.f32.xlu0 %v1190_v31 }
 0x137   : > { %1290 = vadd.xlane.f32.xlu1 %v1289_v50  ;;  %1287 = vadd.xlane.f32.xlu0 %v1286_v51 }
 0x13b   : > { %1200 = vadd.xlane.f32.xlu1 %v1199_v5  ;;  %1197 = vadd.xlane.f32.xlu0 %v1196_v29 }
 0x13f   : > { %1296 = vadd.xlane.f32.xlu1 %v1295_v40  ;;  %1293 = vadd.xlane.f32.xlu0 %v1292_v34 }
 0x143   : > { %1206 = vadd.xlane.f32.xlu1 %v1205_v3  ;;  %1203 = vadd.xlane.f32.xlu0 %v1202_v19 }
 0x147   : > { %1302 = vadd.xlane.f32.xlu1 %v1301_v53  ;;  %1299 = vadd.xlane.f32.xlu0 %v1298_v38 }
 0x14b   : > { %1212 = vadd.xlane.f32.xlu1 %v1211_v45  ;;  %1209 = vadd.xlane.f32.xlu0 %v1208_v41 }
 0x14f   : > { %1308 = vadd.xlane.f32.xlu1 %v1307_v22  ;;  %1305 = vadd.xlane.f32.xlu0 %v1304_v54 }
 0x153   : > { %1218 = vadd.xlane.f32.xlu1 %v1217_v35  ;;  %1215 = vadd.xlane.f32.xlu0 %v1214_v63 }
 0x157   : > { %1314 = vadd.xlane.f32.xlu1 %v1313_v61  ;;  %1311 = vadd.xlane.f32.xlu0 %v1310_v49 }
 0x164   : > { %v1225_v13 = vpop.xlane.xlu1 %1224  ;;  %v1129_v0 = vpop.xlane.xlu0 %1128 }
 0x165   : > { %v1351_v52 = vadd.f32 %v2689_v30, %v1225_v13  ;;  %v1319_v60 = vadd.f32 %v2689_v30, %v1129_v0 }
 0x167   : > { %1416 = vst.msk [vmem:[%s2695_s19 + $0x108] sm:$0xff] %vm1382_vm2, %v1351_v52  ;;  %1384 = vst.msk [vmem:[%s2695_s19 + $0x8] sm:$0xff] %vm1382_vm2, %v1319_v60 }
 0x168   : > { %v1135_v14 = vpop.xlane.xlu1 %1134  ;;  %v1126_v47 = vpop.xlane.xlu0 %1125 }
 0x169   : > { %v1321_v17 = vadd.f32 %v2689_v30, %v1135_v14  ;;  %v1318_v11 = vadd.f32 %v2689_v30, %v1126_v47 }
 0x16b   : > { %1386 = vst.msk [vmem:[%s2695_s19 + $0x18] sm:$0xff] %vm1382_vm2, %v1321_v17  ;;  %1383 = vst.msk [vmem:[%s2695_s19] sm:$0xff] %vm1382_vm2, %v1318_v11 }
 0x16c   : > { %v1231_v48 = vpop.xlane.xlu1 %1230  ;;  %v1222_v12 = vpop.xlane.xlu0 %1221 }
 0x16d   : > { %v1353_v1 = vadd.f32 %v2689_v30, %v1231_v48  ;;  %v1350_v23 = vadd.f32 %v2689_v30, %v1222_v12 }
 0x16f   : > { %1418 = vst.msk [vmem:[%s2695_s19 + $0x118] sm:$0xff] %vm1382_vm2, %v1353_v1  ;;  %1415 = vst.msk [vmem:[%s2695_s19 + $0x100] sm:$0xff] %vm1382_vm2, %v1350_v23 }
 0x170   : > { %v1132_v8 = vpop.xlane.xlu1 %1131  ;;  %v1228_v15 = vpop.xlane.xlu0 %1227 }
 0x171   : > { %v1320_v21 = vadd.f32 %v2689_v30, %v1132_v8  ;;  %v1352_v59 = vadd.f32 %v2689_v30, %v1228_v15 }
 0x173   : > { %1385 = vst.msk [vmem:[%s2695_s19 + $0x10] sm:$0xff] %vm1382_vm2, %v1320_v21  ;;  %1417 = vst.msk [vmem:[%s2695_s19 + $0x110] sm:$0xff] %vm1382_vm2, %v1352_v59 }
 0x174   : > { %v1141_v16 = vpop.xlane.xlu1 %1140  ;;  %v1138_v31 = vpop.xlane.xlu0 %1137 }
 0x175   : > { %v1323_v36 = vadd.f32 %v2689_v30, %v1141_v16  ;;  %v1322_v42 = vadd.f32 %v2689_v30, %v1138_v31 }
 0x177   : > { %1388 = vst.msk [vmem:[%s2695_s19 + $0x28] sm:$0xff] %vm1382_vm2, %v1323_v36  ;;  %1387 = vst.msk [vmem:[%s2695_s19 + $0x20] sm:$0xff] %vm1382_vm2, %v1322_v42 }
 0x178   : > { %v1237_v27 = vpop.xlane.xlu1 %1236  ;;  %v1234_v50 = vpop.xlane.xlu0 %1233 }
 0x179   : > { %v1355_v51 = vadd.f32 %v2689_v30, %v1237_v27  ;;  %v1354_v33 = vadd.f32 %v2689_v30, %v1234_v50 }
 0x17b   : > { %1420 = vst.msk [vmem:[%s2695_s19 + $0x128] sm:$0xff] %vm1382_vm2, %v1355_v51  ;;  %1419 = vst.msk [vmem:[%s2695_s19 + $0x120] sm:$0xff] %vm1382_vm2, %v1354_v33 }
 0x17c   : > { %v1147_v18 = vpop.xlane.xlu1 %1146  ;;  %v1144_v55 = vpop.xlane.xlu0 %1143 }
 0x17d   : > { %v1325_v28 = vadd.f32 %v2689_v30, %v1147_v18  ;;  %v1324_v5 = vadd.f32 %v2689_v30, %v1144_v55 }
 0x17f   : > { %1390 = vst.msk [vmem:[%s2695_s19 + $0x38] sm:$0xff] %vm1382_vm2, %v1325_v28  ;;  %1389 = vst.msk [vmem:[%s2695_s19 + $0x30] sm:$0xff] %vm1382_vm2, %v1324_v5 }
 0x180   : > { %v1243_v29 = vpop.xlane.xlu1 %1242  ;;  %v1240_v2 = vpop.xlane.xlu0 %1239 }
 0x181   : > { %v1357_v26 = vadd.f32 %v2689_v30, %v1243_v29  ;;  %v1356_v37 = vadd.f32 %v2689_v30, %v1240_v2 }
 0x183   : > { %1422 = vst.msk [vmem:[%s2695_s19 + $0x138] sm:$0xff] %vm1382_vm2, %v1357_v26  ;;  %1421 = vst.msk [vmem:[%s2695_s19 + $0x130] sm:$0xff] %vm1382_vm2, %v1356_v37 }
 0x184   : > { %v1153_v39 = vpop.xlane.xlu1 %1152  ;;  %v1150_v40 = vpop.xlane.xlu0 %1149 }
 0x185   : > { %v1327_v34 = vadd.f32 %v2689_v30, %v1153_v39  ;;  %v1326_v62 = vadd.f32 %v2689_v30, %v1150_v40 }
 0x187   : > { %1392 = vst.msk [vmem:[%s2695_s19 + $0x48] sm:$0xff] %vm1382_vm2, %v1327_v34  ;;  %1391 = vst.msk [vmem:[%s2695_s19 + $0x40] sm:$0xff] %vm1382_vm2, %v1326_v62 }
 0x188   : > { %v1249_v57 = vpop.xlane.xlu1 %1248  ;;  %v1246_v6 = vpop.xlane.xlu0 %1245 }
 0x189   : > { %v1359_v7 = vadd.f32 %v2689_v30, %v1249_v57  ;;  %v1358_v3 = vadd.f32 %v2689_v30, %v1246_v6 }
 0x18b   : > { %1424 = vst.msk [vmem:[%s2695_s19 + $0x148] sm:$0xff] %vm1382_vm2, %v1359_v7  ;;  %1423 = vst.msk [vmem:[%s2695_s19 + $0x140] sm:$0xff] %vm1382_vm2, %v1358_v3 }
 0x18c   : > { %v1159_v19 = vpop.xlane.xlu1 %1158  ;;  %v1156_v24 = vpop.xlane.xlu0 %1155 }
 0x18d   : > { %v1329_v4 = vadd.f32 %v2689_v30, %v1159_v19  ;;  %v1328_v43 = vadd.f32 %v2689_v30, %v1156_v24 }
 0x18f   : > { %1394 = vst.msk [vmem:[%s2695_s19 + $0x58] sm:$0xff] %vm1382_vm2, %v1329_v4  ;;  %1393 = vst.msk [vmem:[%s2695_s19 + $0x50] sm:$0xff] %vm1382_vm2, %v1328_v43 }
 0x190   : > { %v1255_v53 = vpop.xlane.xlu1 %1254  ;;  %v1252_v38 = vpop.xlane.xlu0 %1251 }
 0x191   : > { %v1361_v9 = vadd.f32 %v2689_v30, %v1255_v53  ;;  %v1360_v25 = vadd.f32 %v2689_v30, %v1252_v38 }
 0x193   : > { %1426 = vst.msk [vmem:[%s2695_s19 + $0x158] sm:$0xff] %vm1382_vm2, %v1361_v9  ;;  %1425 = vst.msk [vmem:[%s2695_s19 + $0x150] sm:$0xff] %vm1382_vm2, %v1360_v25 }
 0x194   : > { %v1165_v44 = vpop.xlane.xlu1 %1164  ;;  %v1162_v45 = vpop.xlane.xlu0 %1161 }
 0x195   : > { %v1331_v41 = vadd.f32 %v2689_v30, %v1165_v44  ;;  %v1330_v32 = vadd.f32 %v2689_v30, %v1162_v45 }
 0x197   : > { %1396 = vst.msk [vmem:[%s2695_s19 + $0x68] sm:$0xff] %vm1382_vm2, %v1331_v41  ;;  %1395 = vst.msk [vmem:[%s2695_s19 + $0x60] sm:$0xff] %vm1382_vm2, %v1330_v32 }
 0x198   : > { %v1261_v20 = vpop.xlane.xlu1 %1260  ;;  %v1258_v56 = vpop.xlane.xlu0 %1257 }
 0x199   : > { %v1363_v22 = vadd.f32 %v2689_v30, %v1261_v20  ;;  %v1362_v54 = vadd.f32 %v2689_v30, %v1258_v56 }
 0x19b   : > { %1428 = vst.msk [vmem:[%s2695_s19 + $0x168] sm:$0xff] %vm1382_vm2, %v1363_v22  ;;  %1427 = vst.msk [vmem:[%s2695_s19 + $0x160] sm:$0xff] %vm1382_vm2, %v1362_v54 }
 0x19c   : > { %v1171_v10 = vpop.xlane.xlu1 %1170  ;;  %v1168_v58 = vpop.xlane.xlu0 %1167 }
 0x19d   : > { %v1333_v35 = vadd.f32 %v2689_v30, %v1171_v10  ;;  %v1332_v63 = vadd.f32 %v2689_v30, %v1168_v58 }
 0x19f   : > { %1398 = vst.msk [vmem:[%s2695_s19 + $0x78] sm:$0xff] %vm1382_vm2, %v1333_v35  ;;  %1397 = vst.msk [vmem:[%s2695_s19 + $0x70] sm:$0xff] %vm1382_vm2, %v1332_v63 }
 0x1a0   : > { %v1267_v46 = vpop.xlane.xlu1 %1266  ;;  %v1264_v61 = vpop.xlane.xlu0 %1263 }
 0x1a1   : > { %v1365_v49 = vadd.f32 %v2689_v30, %v1267_v46  ;;  %v1364_v13 = vadd.f32 %v2689_v30, %v1264_v61 }
 0x1a3   : > { %1430 = vst.msk [vmem:[%s2695_s19 + $0x178] sm:$0xff] %vm1382_vm2, %v1365_v49  ;;  %1429 = vst.msk [vmem:[%s2695_s19 + $0x170] sm:$0xff] %vm1382_vm2, %v1364_v13 }
 0x1a4   : > { %v1177_v0 = vpop.xlane.xlu1 %1176  ;;  %v1174_v52 = vpop.xlane.xlu0 %1173 }
 0x1a5   : > { %v1335_v60 = vadd.f32 %v2689_v30, %v1177_v0  ;;  %v1334_v14 = vadd.f32 %v2689_v30, %v1174_v52 }
 0x1a7   : > { %1400 = vst.msk [vmem:[%s2695_s19 + $0x88] sm:$0xff] %vm1382_vm2, %v1335_v60  ;;  %1399 = vst.msk [vmem:[%s2695_s19 + $0x80] sm:$0xff] %vm1382_vm2, %v1334_v14 }
 0x1a8   : > { %v1273_v47 = vpop.xlane.xlu1 %1272  ;;  %v1270_v17 = vpop.xlane.xlu0 %1269 }
 0x1a9   : > { %v1367_v11 = vadd.f32 %v2689_v30, %v1273_v47  ;;  %v1366_v48 = vadd.f32 %v2689_v30, %v1270_v17 }
 0x1ab   : > { %1432 = vst.msk [vmem:[%s2695_s19 + $0x188] sm:$0xff] %vm1382_vm2, %v1367_v11  ;;  %1431 = vst.msk [vmem:[%s2695_s19 + $0x180] sm:$0xff] %vm1382_vm2, %v1366_v48 }
 0x1ac   : > { %v1183_v12 = vpop.xlane.xlu1 %1182  ;;  %v1180_v1 = vpop.xlane.xlu0 %1179 }
 0x1ad   : > { %v1337_v23 = vadd.f32 %v2689_v30, %v1183_v12  ;;  %v1336_v8 = vadd.f32 %v2689_v30, %v1180_v1 }
 0x1af   : > { %1402 = vst.msk [vmem:[%s2695_s19 + $0x98] sm:$0xff] %vm1382_vm2, %v1337_v23  ;;  %1401 = vst.msk [vmem:[%s2695_s19 + $0x90] sm:$0xff] %vm1382_vm2, %v1336_v8 }
 0x1b0   : > { %v1279_v15 = vpop.xlane.xlu1 %1278  ;;  %v1276_v21 = vpop.xlane.xlu0 %1275 }
 0x1b1   : > { %v1369_v59 = vadd.f32 %v2689_v30, %v1279_v15  ;;  %v1368_v16 = vadd.f32 %v2689_v30, %v1276_v21 }
 0x1b3   : > { %1434 = vst.msk [vmem:[%s2695_s19 + $0x198] sm:$0xff] %vm1382_vm2, %v1369_v59  ;;  %1433 = vst.msk [vmem:[%s2695_s19 + $0x190] sm:$0xff] %vm1382_vm2, %v1368_v16 }
 0x1b4   : > { %v1189_v31 = vpop.xlane.xlu1 %1188  ;;  %v1186_v36 = vpop.xlane.xlu0 %1185 }
 0x1b5   : > { %v1339_v42 = vadd.f32 %v2689_v30, %v1189_v31  ;;  %v1338_v27 = vadd.f32 %v2689_v30, %v1186_v36 }
 0x1b7   : > { %1404 = vst.msk [vmem:[%s2695_s19 + $0xa8] sm:$0xff] %vm1382_vm2, %v1339_v42  ;;  %1403 = vst.msk [vmem:[%s2695_s19 + $0xa0] sm:$0xff] %vm1382_vm2, %v1338_v27 }
 0x1b8   : > { %v1285_v50 = vpop.xlane.xlu1 %1284  ;;  %v1282_v51 = vpop.xlane.xlu0 %1281 }
 0x1b9   : > { %v1371_v33 = vadd.f32 %v2689_v30, %v1285_v50  ;;  %v1370_v18 = vadd.f32 %v2689_v30, %v1282_v51 }
 0x1bb   : > { %1436 = vst.msk [vmem:[%s2695_s19 + $0x1a8] sm:$0xff] %vm1382_vm2, %v1371_v33  ;;  %1435 = vst.msk [vmem:[%s2695_s19 + $0x1a0] sm:$0xff] %vm1382_vm2, %v1370_v18 }
 0x1bc   : > { %v1195_v55 = vpop.xlane.xlu1 %1194  ;;  %v1192_v28 = vpop.xlane.xlu0 %1191 }
 0x1bd   : > { %v1341_v5 = vadd.f32 %v2689_v30, %v1195_v55  ;;  %v1340_v29 = vadd.f32 %v2689_v30, %v1192_v28 }
 0x1bf   : > { %1406 = vst.msk [vmem:[%s2695_s19 + $0xb8] sm:$0xff] %vm1382_vm2, %v1341_v5  ;;  %1405 = vst.msk [vmem:[%s2695_s19 + $0xb0] sm:$0xff] %vm1382_vm2, %v1340_v29 }
 0x1c0   : > { %v1291_v2 = vpop.xlane.xlu1 %1290  ;;  %v1288_v26 = vpop.xlane.xlu0 %1287 }
 0x1c1   : > { %v1373_v37 = vadd.f32 %v2689_v30, %v1291_v2  ;;  %v1372_v39 = vadd.f32 %v2689_v30, %v1288_v26 }
 0x1c3   : > { %1438 = vst.msk [vmem:[%s2695_s19 + $0x1b8] sm:$0xff] %vm1382_vm2, %v1373_v37  ;;  %1437 = vst.msk [vmem:[%s2695_s19 + $0x1b0] sm:$0xff] %vm1382_vm2, %v1372_v39 }
 0x1c4   : > { %v1201_v40 = vpop.xlane.xlu1 %1200  ;;  %v1198_v34 = vpop.xlane.xlu0 %1197 }
 0x1c5   : > { %v1343_v62 = vadd.f32 %v2689_v30, %v1201_v40  ;;  %v1342_v57 = vadd.f32 %v2689_v30, %v1198_v34 }
 0x1c7   : > { %1408 = vst.msk [vmem:[%s2695_s19 + $0xc8] sm:$0xff] %vm1382_vm2, %v1343_v62  ;;  %1407 = vst.msk [vmem:[%s2695_s19 + $0xc0] sm:$0xff] %vm1382_vm2, %v1342_v57 }
 0x1c8   : > { %v1297_v6 = vpop.xlane.xlu1 %1296  ;;  %v1294_v7 = vpop.xlane.xlu0 %1293 }
 0x1c9   : > { %v1375_v3 = vadd.f32 %v2689_v30, %v1297_v6  ;;  %v1374_v19 = vadd.f32 %v2689_v30, %v1294_v7 }
 0x1cb   : > { %1440 = vst.msk [vmem:[%s2695_s19 + $0x1c8] sm:$0xff] %vm1382_vm2, %v1375_v3  ;;  %1439 = vst.msk [vmem:[%s2695_s19 + $0x1c0] sm:$0xff] %vm1382_vm2, %v1374_v19 }
 0x1cc   : > { %v1207_v24 = vpop.xlane.xlu1 %1206  ;;  %v1204_v4 = vpop.xlane.xlu0 %1203 }
 0x1cd   : > { %v1345_v43 = vadd.f32 %v2689_v30, %v1207_v24  ;;  %v1344_v53 = vadd.f32 %v2689_v30, %v1204_v4 }
 0x1cf   : > { %1410 = vst.msk [vmem:[%s2695_s19 + $0xd8] sm:$0xff] %vm1382_vm2, %v1345_v43  ;;  %1409 = vst.msk [vmem:[%s2695_s19 + $0xd0] sm:$0xff] %vm1382_vm2, %v1344_v53 }
 0x1d0   : > { %v1303_v38 = vpop.xlane.xlu1 %1302  ;;  %v1300_v9 = vpop.xlane.xlu0 %1299 }
 0x1d1   : > { %v1377_v25 = vadd.f32 %v2689_v30, %v1303_v38  ;;  %v1376_v44 = vadd.f32 %v2689_v30, %v1300_v9 }
 0x1d3   : > { %1442 = vst.msk [vmem:[%s2695_s19 + $0x1d8] sm:$0xff] %vm1382_vm2, %v1377_v25  ;;  %1441 = vst.msk [vmem:[%s2695_s19 + $0x1d0] sm:$0xff] %vm1382_vm2, %v1376_v44 }
 0x1d4   : > { %v1213_v45 = vpop.xlane.xlu1 %1212  ;;  %v1210_v41 = vpop.xlane.xlu0 %1209 }
 0x1d5   : > { %v1347_v32 = vadd.f32 %v2689_v30, %v1213_v45  ;;  %v1346_v20 = vadd.f32 %v2689_v30, %v1210_v41 }
 0x1d7   : > { %1412 = vst.msk [vmem:[%s2695_s19 + $0xe8] sm:$0xff] %vm1382_vm2, %v1347_v32  ;;  %1411 = vst.msk [vmem:[%s2695_s19 + $0xe0] sm:$0xff] %vm1382_vm2, %v1346_v20 }
 0x1d8   : > { %v1309_v56 = vpop.xlane.xlu1 %1308  ;;  %v1306_v22 = vpop.xlane.xlu0 %1305 }
 0x1d9   : > { %v1379_v54 = vadd.f32 %v2689_v30, %v1309_v56  ;;  %v1378_v10 = vadd.f32 %v2689_v30, %v1306_v22 }
 0x1db   : > { %1444 = vst.msk [vmem:[%s2695_s19 + $0x1e8] sm:$0xff] %vm1382_vm2, %v1379_v54  ;;  %1443 = vst.msk [vmem:[%s2695_s19 + $0x1e0] sm:$0xff] %vm1382_vm2, %v1378_v10 }
 0x1dc   : > { %v1219_v58 = vpop.xlane.xlu1 %1218  ;;  %v1216_v35 = vpop.xlane.xlu0 %1215 }
 0x1dd   : > { %v1349_v63 = vadd.f32 %v2689_v30, %v1219_v58  ;;  %v1348_v46 = vadd.f32 %v2689_v30, %v1216_v35 }
 0x1df   : > { %1414 = vst.msk [vmem:[%s2695_s19 + $0xf8] sm:$0xff] %vm1382_vm2, %v1349_v63  ;;  %1413 = vst.msk [vmem:[%s2695_s19 + $0xf0] sm:$0xff] %vm1382_vm2, %v1348_v46 }
 0x1e0   : > { %v1315_v61 = vpop.xlane.xlu1 %1314  ;;  %v1312_v49 = vpop.xlane.xlu0 %1311 }
 0x1e1   : > { %v1381_v13 = vadd.f32 %v2689_v30, %v1315_v61  ;;  %v1380_v0 = vadd.f32 %v2689_v30, %v1312_v49 }
 0x1e3   : > { %1446 = vst.msk [vmem:[%s2695_s19 + $0x1f8] sm:$0xff] %vm1382_vm2, %v1381_v13  ;;  %1445 = vst.msk [vmem:[%s2695_s19 + $0x1f0] sm:$0xff] %vm1382_vm2, %v1380_v0 }
 0x1e4 PF: > { %s18_s23 = sadd.s32 1, %s1801_s23  }
 0x1e5   : > { %p15_p4 = scmp.ge.s32.totalorder %s18_s23, 4  }
 0x1e7   :  { %17 = sbr.rel (!%p15_p4) target bundleno = 2 (0x2), region = 82 }

</bundles_post_ra>
